<compile_context>
chip_gen: v5e
topology: v5e:2x2
jax: 0.10.0
libtpu: 0.0.40
codegen_flags: <defaults>
</compile_context>

<pallas_src>
import functools

import jax
import jax.numpy as jnp
from jax.experimental import pallas as pl
from jax.experimental.pallas import tpu as pltpu


def double_conv_kernel(x_ref, w1_ref, s1_ref, sh1_ref, w2_ref, s2_ref, sh2_ref,
                       o_ref, *, H, W, cin, cout):
    """One grid step = one image, both conv stages fused.

    Layouts (lane-dense, spatial width packed into lanes):
      x_ref   : (1, H, W*cin)          bf16   input image
      w*_ref  : (3*(W+2)*C, W*cout)    bf16   block-banded im2col weights
      s*/sh*  : (1, W*cout)            f32    folded BN scale / shift
      o_ref   : (1, H, W*cout)         f32
    """

    def stage(act_f32, C, w_ref, s_ref, sh_ref):
        # act_f32: (H, W*C) f32. Build the 1-pixel zero halo as a value
        # (pure lane / sublane concatenates -- no partial ref stores).
        zl = jnp.zeros((H, C), jnp.float32)
        rows = jnp.concatenate([zl, act_f32, zl], axis=1)        # (H, (W+2)*C)
        zr = jnp.zeros((1, (W + 2) * C), jnp.float32)
        padded = jnp.concatenate([zr, rows, zr], axis=0)         # (H+2, (W+2)*C)
        # The 3 dy row-shifts concatenated along K -> one MXU matmul per stage.
        patches = jnp.concatenate(
            [padded[dy:dy + H, :] for dy in range(3)], axis=1)   # (H, 3*(W+2)*C)
        acc = jnp.dot(patches.astype(jnp.bfloat16), w_ref[...],
                      preferred_element_type=jnp.float32)        # (H, W*cout) f32
        y = acc * s_ref[...] + sh_ref[...]     # folded BatchNorm (+ conv bias)
        return jnp.maximum(y, 0.0)             # ReLU

    y1 = stage(x_ref[0].astype(jnp.float32), cin, w1_ref, s1_ref, sh1_ref)
    y2 = stage(y1, cout, w2_ref, s2_ref, sh2_ref)
    o_ref[0] = y2.astype(o_ref.dtype)          # lane-dense (H, W*cout) store


def _banded_im2col_weights(w_hwio, W):
    """(3,3,C,Cout) HWIO -> (3*(W+2)*C, W*Cout) block-banded matrix so that
    concat_dy(padded[dy:dy+H, :]) @ result == SAME-padded 3x3 conv with the
    output laid out lane-dense as (H, W*Cout)."""
    KH, KW, C, Co = w_hwio.shape
    W2 = W + 2
    blk = w_hwio.reshape(KH, KW * C, Co)                  # (3, 3*C, Cout)
    wb = jnp.zeros((KH, W2 * C, W * Co), w_hwio.dtype)
    for x in range(W):                                    # trace-time loop
        wb = wb.at[:, x * C:x * C + KW * C, x * Co:(x + 1) * Co].set(blk)
    return wb.reshape(KH * W2 * C, W * Co)


def _fold_bn(conv_bias, gamma, beta, mean, var, W, eps=1e-5):
    """Fold conv bias + inference-mode BatchNorm into scale/shift, tiled over
    the W spatial positions that are packed into lanes."""
    scale = gamma / jnp.sqrt(var + eps)
    shift = beta + scale * (conv_bias - mean)
    return jnp.tile(scale, W).reshape(1, -1), jnp.tile(shift, W).reshape(1, -1)


@jax.jit
def double_conv(x_nchw, params):
    """Pallas implementation of DoubleConv.forward. Input/output are NCHW."""
    N, Cin, H, W = x_nchw.shape
    Cout = params["w1"].shape[-1]

    x = jnp.transpose(x_nchw, (0, 2, 3, 1))               # NCHW -> NHWC
    x = x.reshape(N, H, W * Cin).astype(jnp.bfloat16)     # spatial -> lanes

    wb1 = _banded_im2col_weights(params["w1"], W).astype(jnp.bfloat16)
    wb2 = _banded_im2col_weights(params["w2"], W).astype(jnp.bfloat16)
    s1, sh1 = _fold_bn(params["b1"], params["g1"], params["be1"],
                       params["m1"], params["v1"], W)
    s2, sh2 = _fold_bn(params["b2"], params["g2"], params["be2"],
                       params["m2"], params["v2"], W)

    kernel = functools.partial(double_conv_kernel, H=H, W=W, cin=Cin, cout=Cout)
    out = pl.pallas_call(
        kernel,
        out_shape=jax.ShapeDtypeStruct((N, H, W * Cout), jnp.float32),
        grid=(N,),
        in_specs=[
            pl.BlockSpec((1, H, W * Cin), lambda n: (n, 0, 0)),
            pl.BlockSpec(wb1.shape, lambda n: (0, 0)),
            pl.BlockSpec(s1.shape, lambda n: (0, 0)),
            pl.BlockSpec(sh1.shape, lambda n: (0, 0)),
            pl.BlockSpec(wb2.shape, lambda n: (0, 0)),
            pl.BlockSpec(s2.shape, lambda n: (0, 0)),
            pl.BlockSpec(sh2.shape, lambda n: (0, 0)),
        ],
        out_specs=pl.BlockSpec((1, H, W * Cout), lambda n: (n, 0, 0)),
        compiler_params=pltpu.CompilerParams(
            dimension_semantics=("parallel",)),
    )(x, wb1, s1, sh1, wb2, s2, sh2)

    out = out.reshape(N, H, W, Cout)                       # free reshape
    return jnp.transpose(out, (0, 3, 1, 2))                # NHWC -> NCHW


# ------------------------- pure-JAX reference -------------------------
def _ref_stage(x, w, b, gamma, beta, mean, var, eps=1e-5):
    y = jax.lax.conv_general_dilated(
        x, w, window_strides=(1, 1), padding="SAME",
        dimension_numbers=("NHWC", "HWIO", "NHWC"),
        precision=jax.lax.Precision.HIGHEST) + b
    y = gamma * (y - mean) / jnp.sqrt(var + eps) + beta
    return jnp.maximum(y, 0.0)


def double_conv_ref(x_nchw, p):
    # Mirrors the kernel's bf16 quantization of the matmul operands and of the
    # intermediate activation; accumulation / BN stay f32.
    q = lambda a: a.astype(jnp.bfloat16).astype(jnp.float32)
    x = jnp.transpose(x_nchw, (0, 2, 3, 1))
    y = _ref_stage(q(x), q(p["w1"]), p["b1"], p["g1"], p["be1"], p["m1"], p["v1"])
    y = _ref_stage(q(y), q(p["w2"]), p["b2"], p["g2"], p["be2"], p["m2"], p["v2"])
    return jnp.transpose(y, (0, 3, 1, 2))


if __name__ == "__main__":
    N, Cin, Cout, H, W = 2, 4, 8, 16, 16

    key = jax.random.PRNGKey(0)
    keys = jax.random.split(key, 13)
    x = jax.random.normal(keys[0], (N, Cin, H, W), dtype=jnp.float32)

    params = {
        # conv1 (3,3,Cin,Cout) HWIO, conv2 (3,3,Cout,Cout)
        "w1": 0.1 * jax.random.normal(keys[1], (3, 3, Cin, Cout), jnp.float32),
        "b1": 0.05 * jax.random.normal(keys[2], (Cout,), jnp.float32),
        "g1": 1.0 + 0.1 * jax.random.normal(keys[3], (Cout,), jnp.float32),
        "be1": 0.05 * jax.random.normal(keys[4], (Cout,), jnp.float32),
        "m1": 0.05 * jax.random.normal(keys[5], (Cout,), jnp.float32),
        "v1": 1.0 + 0.1 * jnp.abs(jax.random.normal(keys[6], (Cout,), jnp.float32)),
        "w2": 0.1 * jax.random.normal(keys[7], (3, 3, Cout, Cout), jnp.float32),
        "b2": 0.05 * jax.random.normal(keys[8], (Cout,), jnp.float32),
        "g2": 1.0 + 0.1 * jax.random.normal(keys[9], (Cout,), jnp.float32),
        "be2": 0.05 * jax.random.normal(keys[10], (Cout,), jnp.float32),
        "m2": 0.05 * jax.random.normal(keys[11], (Cout,), jnp.float32),
        "v2": 1.0 + 0.1 * jnp.abs(jax.random.normal(keys[12], (Cout,), jnp.float32)),
    }

    out = jax.block_until_ready(double_conv(x, params))
    ref = jax.block_until_ready(double_conv_ref(x, params))

    assert out.shape == (N, Cout, H, W), out.shape
    err = float(jnp.max(jnp.abs(out - ref)))
    assert err < 2e-3, err
    print("KERNEL_OK")
</pallas_src>

<mosaic_0001>
module attributes {stable_mosaic.version = 11 : i64} {
  func.func @double_conv_kernel(%arg0: i32, %arg1: memref<1x16x64xbf16, #tpu.memory_space<vmem>>, %arg2: memref<216x128xbf16, #tpu.memory_space<vmem>>, %arg3: memref<1x128xf32, #tpu.memory_space<vmem>>, %arg4: memref<1x128xf32, #tpu.memory_space<vmem>>, %arg5: memref<432x128xbf16, #tpu.memory_space<vmem>>, %arg6: memref<1x128xf32, #tpu.memory_space<vmem>>, %arg7: memref<1x128xf32, #tpu.memory_space<vmem>>, %arg8: memref<1x16x128xf32, #tpu.memory_space<vmem>>) attributes {dimension_semantics = [#tpu.dimension_semantics<parallel>], iteration_bounds = array<i64: 2>, scalar_prefetch = 0 : i64, scratch_operands = 0 : i64, tpu.core_type = #tpu.core_type<tc>, window_params = [{transform_indices = @transform_0, window_bounds = array<i64: 1, 16, 64>}, {pipeline_mode = #tpu.pipeline_mode<synchronous>, transform_indices = @transform_1, window_bounds = array<i64: 216, 128>}, {pipeline_mode = #tpu.pipeline_mode<synchronous>, transform_indices = @transform_2, window_bounds = array<i64: 1, 128>}, {pipeline_mode = #tpu.pipeline_mode<synchronous>, transform_indices = @transform_3, window_bounds = array<i64: 1, 128>}, {pipeline_mode = #tpu.pipeline_mode<synchronous>, transform_indices = @transform_4, window_bounds = array<i64: 432, 128>}, {pipeline_mode = #tpu.pipeline_mode<synchronous>, transform_indices = @transform_5, window_bounds = array<i64: 1, 128>}, {pipeline_mode = #tpu.pipeline_mode<synchronous>, transform_indices = @transform_6, window_bounds = array<i64: 1, 128>}, {transform_indices = @transform_7, window_bounds = array<i64: 1, 16, 128>}]} {
    %c0 = arith.constant 0 : index
    %c0_0 = arith.constant 0 : index
    %c0_1 = arith.constant 0 : index
    %0 = vector.load %arg1[%c0, %c0_0, %c0_1] : memref<1x16x64xbf16, #tpu.memory_space<vmem>>, vector<1x16x64xbf16>
    %1 = vector.shape_cast %0 : vector<1x16x64xbf16> to vector<16x64xbf16>
    %2 = arith.extf %1 : vector<16x64xbf16> to vector<16x64xf32>
    %cst = arith.constant 0.000000e+00 : f32
    %3 = vector.broadcast %cst : f32 to vector<16x4xf32>
    %4 = tpu.concatenate %3, %2, %3 in 1 : vector<16x4xf32>, vector<16x64xf32>, vector<16x4xf32> -> vector<16x72xf32>
    %cst_2 = arith.constant 0.000000e+00 : f32
    %5 = vector.broadcast %cst_2 : f32 to vector<1x72xf32>
    %6 = tpu.concatenate %5, %4, %5 in 0 : vector<1x72xf32>, vector<16x72xf32>, vector<1x72xf32> -> vector<18x72xf32>
    %7 = vector.extract_strided_slice %6 {offsets = [0, 0], sizes = [16, 72], strides = [1, 1]} : vector<18x72xf32> to vector<16x72xf32>
    %8 = vector.extract_strided_slice %6 {offsets = [1, 0], sizes = [16, 72], strides = [1, 1]} : vector<18x72xf32> to vector<16x72xf32>
    %9 = vector.extract_strided_slice %6 {offsets = [2, 0], sizes = [16, 72], strides = [1, 1]} : vector<18x72xf32> to vector<16x72xf32>
    %10 = tpu.concatenate %7, %8, %9 in 1 : vector<16x72xf32>, vector<16x72xf32>, vector<16x72xf32> -> vector<16x216xf32>
    %11 = arith.truncf %10 : vector<16x216xf32> to vector<16x216xbf16>
    %c0_3 = arith.constant 0 : index
    %c0_4 = arith.constant 0 : index
    %12 = vector.load %arg2[%c0_3, %c0_4] : memref<216x128xbf16, #tpu.memory_space<vmem>>, vector<216x128xbf16>
    %cst_5 = arith.constant dense<0.000000e+00> : vector<16x128xf32>
    %13 = tpu.matmul %11, %12, %cst_5 {dimension_numbers = #tpu.dot_dimension_numbers<[1], [0], [0], [1], [0, 0, 1, 1], [], []>} : vector<16x216xbf16>, vector<216x128xbf16>, vector<16x128xf32> -> vector<16x128xf32>
    %c0_6 = arith.constant 0 : index
    %c0_7 = arith.constant 0 : index
    %14 = vector.load %arg3[%c0_6, %c0_7] : memref<1x128xf32, #tpu.memory_space<vmem>>, vector<1x128xf32>
    %15 = vector.broadcast %14 : vector<1x128xf32> to vector<16x128xf32>
    %16 = arith.mulf %13, %15 : vector<16x128xf32>
    %c0_8 = arith.constant 0 : index
    %c0_9 = arith.constant 0 : index
    %17 = vector.load %arg4[%c0_8, %c0_9] : memref<1x128xf32, #tpu.memory_space<vmem>>, vector<1x128xf32>
    %18 = vector.broadcast %17 : vector<1x128xf32> to vector<16x128xf32>
    %19 = arith.addf %16, %18 : vector<16x128xf32>
    %cst_10 = arith.constant 0.000000e+00 : f32
    %20 = vector.broadcast %cst_10 : f32 to vector<16x128xf32>
    %21 = arith.maximumf %19, %20 : vector<16x128xf32>
    %cst_11 = arith.constant 0.000000e+00 : f32
    %22 = vector.broadcast %cst_11 : f32 to vector<16x8xf32>
    %23 = tpu.concatenate %22, %21, %22 in 1 : vector<16x8xf32>, vector<16x128xf32>, vector<16x8xf32> -> vector<16x144xf32>
    %cst_12 = arith.constant 0.000000e+00 : f32
    %24 = vector.broadcast %cst_12 : f32 to vector<1x144xf32>
    %25 = tpu.concatenate %24, %23, %24 in 0 : vector<1x144xf32>, vector<16x144xf32>, vector<1x144xf32> -> vector<18x144xf32>
    %26 = vector.extract_strided_slice %25 {offsets = [0, 0], sizes = [16, 144], strides = [1, 1]} : vector<18x144xf32> to vector<16x144xf32>
    %27 = vector.extract_strided_slice %25 {offsets = [1, 0], sizes = [16, 144], strides = [1, 1]} : vector<18x144xf32> to vector<16x144xf32>
    %28 = vector.extract_strided_slice %25 {offsets = [2, 0], sizes = [16, 144], strides = [1, 1]} : vector<18x144xf32> to vector<16x144xf32>
    %29 = tpu.concatenate %26, %27, %28 in 1 : vector<16x144xf32>, vector<16x144xf32>, vector<16x144xf32> -> vector<16x432xf32>
    %30 = arith.truncf %29 : vector<16x432xf32> to vector<16x432xbf16>
    %c0_13 = arith.constant 0 : index
    %c0_14 = arith.constant 0 : index
    %31 = vector.load %arg5[%c0_13, %c0_14] : memref<432x128xbf16, #tpu.memory_space<vmem>>, vector<432x128xbf16>
    %cst_15 = arith.constant dense<0.000000e+00> : vector<16x128xf32>
    %32 = tpu.matmul %30, %31, %cst_15 {dimension_numbers = #tpu.dot_dimension_numbers<[1], [0], [0], [1], [0, 0, 1, 1], [], []>} : vector<16x432xbf16>, vector<432x128xbf16>, vector<16x128xf32> -> vector<16x128xf32>
    %c0_16 = arith.constant 0 : index
    %c0_17 = arith.constant 0 : index
    %33 = vector.load %arg6[%c0_16, %c0_17] : memref<1x128xf32, #tpu.memory_space<vmem>>, vector<1x128xf32>
    %34 = vector.broadcast %33 : vector<1x128xf32> to vector<16x128xf32>
    %35 = arith.mulf %32, %34 : vector<16x128xf32>
    %c0_18 = arith.constant 0 : index
    %c0_19 = arith.constant 0 : index
    %36 = vector.load %arg7[%c0_18, %c0_19] : memref<1x128xf32, #tpu.memory_space<vmem>>, vector<1x128xf32>
    %37 = vector.broadcast %36 : vector<1x128xf32> to vector<16x128xf32>
    %38 = arith.addf %35, %37 : vector<16x128xf32>
    %cst_20 = arith.constant 0.000000e+00 : f32
    %39 = vector.broadcast %cst_20 : f32 to vector<16x128xf32>
    %40 = arith.maximumf %38, %39 : vector<16x128xf32>
    %c0_21 = arith.constant 0 : index
    %c0_22 = arith.constant 0 : index
    %c0_23 = arith.constant 0 : index
    %41 = vector.load %arg8[%c0_21, %c0_22, %c0_23] : memref<1x16x128xf32, #tpu.memory_space<vmem>>, vector<1x16x128xf32>
    %42 = vector.shape_cast %41 : vector<1x16x128xf32> to vector<16x128xf32>
    %43 = vector.shape_cast %40 : vector<16x128xf32> to vector<1x16x128xf32>
    tpu.vector_store %arg8[%c0_21, %c0_22, %c0_23], %43 {strides = array<i32>} : memref<1x16x128xf32, #tpu.memory_space<vmem>>, vector<1x16x128xf32>,
    return
  }
  func.func @transform_0(%arg0: i32) -> (i32, i32, i32) {
    %c0_i32 = arith.constant 0 : i32
    %c0_i32_0 = arith.constant 0 : i32
    %c0_i32_1 = arith.constant 0 : i32
    return %arg0, %c0_i32, %c0_i32_0 : i32, i32, i32
  }
  func.func @transform_1(%arg0: i32) -> (i32, i32) {
    %c0_i32 = arith.constant 0 : i32
    %c0_i32_0 = arith.constant 0 : i32
    %c0_i32_1 = arith.constant 0 : i32
    return %c0_i32, %c0_i32_0 : i32, i32
  }
  func.func @transform_2(%arg0: i32) -> (i32, i32) {
    %c0_i32 = arith.constant 0 : i32
    %c0_i32_0 = arith.constant 0 : i32
    %c0_i32_1 = arith.constant 0 : i32
    return %c0_i32, %c0_i32_0 : i32, i32
  }
  func.func @transform_3(%arg0: i32) -> (i32, i32) {
    %c0_i32 = arith.constant 0 : i32
    %c0_i32_0 = arith.constant 0 : i32
    %c0_i32_1 = arith.constant 0 : i32
    return %c0_i32, %c0_i32_0 : i32, i32
  }
  func.func @transform_4(%arg0: i32) -> (i32, i32) {
    %c0_i32 = arith.constant 0 : i32
    %c0_i32_0 = arith.constant 0 : i32
    %c0_i32_1 = arith.constant 0 : i32
    return %c0_i32, %c0_i32_0 : i32, i32
  }
  func.func @transform_5(%arg0: i32) -> (i32, i32) {
    %c0_i32 = arith.constant 0 : i32
    %c0_i32_0 = arith.constant 0 : i32
    %c0_i32_1 = arith.constant 0 : i32
    return %c0_i32, %c0_i32_0 : i32, i32
  }
  func.func @transform_6(%arg0: i32) -> (i32, i32) {
    %c0_i32 = arith.constant 0 : i32
    %c0_i32_0 = arith.constant 0 : i32
    %c0_i32_1 = arith.constant 0 : i32
    return %c0_i32, %c0_i32_0 : i32, i32
  }
  func.func @transform_7(%arg0: i32) -> (i32, i32, i32) {
    %c0_i32 = arith.constant 0 : i32
    %c0_i32_0 = arith.constant 0 : i32
    %c0_i32_1 = arith.constant 0 : i32
    return %arg0, %c0_i32, %c0_i32_0 : i32, i32, i32
  }
}

</mosaic_0001>

<bundles_post_ra>
// kernel: tile.23
= control target key start
LH: loop header
LB: loop body
LE: loop exit
PB: predicated region body
PF: predicated region fallthrough
CT: control target
= control target key end

     0   :  { %s28_s0 = inlined_call_operand.vmem [shape: f32[8], index: 0, kind: input, shape index: {}]   ;;  %s29_s1 = inlined_call_operand.vmem [shape: f32[16,8], index: 1, kind: output, shape index: {}]  }
   0x1   :  { %v4_v0 = vld [vmem:[%s28_s0] ss:$0 sm:$0xff] }
   0x2   :  { %5 = vst [vmem:[%s29_s1] sm:$0xff] %v4_v0 }
   0x3   :  { %8 = vst [vmem:[%s29_s1 + $0x8] sm:$0xff] %v4_v0 }

// kernel: tile.24
= control target key start
LH: loop header
LB: loop body
LE: loop exit
PB: predicated region body
PF: predicated region fallthrough
CT: control target
= control target key end

     0   :  { %s131_s10 = smov 120   ;;  %s132_s11 = smov 104   ;;  %vm3_vm0 = vcmask 64512   ;;  %vm9_vm1 = vcmask 1048512   ;;  %vm15_vm2 = vcmask 982912   ;;  %vm21_vm3 = vcmask 917312   ;;  %s207_s0 = inlined_call_operand.vmem [shape: f32[16,8], index: 0, kind: input, shape index: {}]   ;;  %s208_s1 = inlined_call_operand.vmem [shape: f32[1,128], index: 1, kind: output, shape index: {}]  }
   0x1   :  { %v101_v0 = vld [vmem:[%s207_s0 + $0xf] sm:$0x1]   ;;  %v103_v1 = vld [vmem:[%s207_s0 + $0xd] sm:$0x1]   ;;  %v105_v2 = vld [vmem:[%s207_s0 + $0xb] sm:$0x1]  }
   0x2   :  { %7 = vrot.lane.b32.xlu0 %v101_v0, %s131_s10  ;;  %19 = vrot.lane.b32.xlu1 %v103_v1, %s132_s11  ;;  %s133_s14 = smov 88   ;;  %v102_v3 = vld [vmem:[%s207_s0 + $0xe] sm:$0x1]   ;;  %v104_v4 = vld [vmem:[%s207_s0 + $0xc] sm:$0x1]   ;;  %s134_s19 = smov 112  }
   0x3   :  { %31 = vrot.lane.b32.xlu2 %v105_v2, %s133_s14  ;;  %s135_s20 = smov 96   ;;  %v106_v5 = vld [vmem:[%s207_s0 + $0xa] sm:$0x1]   ;;  %s136_s23 = smov 80   ;;  %v107_v6 = vld [vmem:[%s207_s0 + $0x9] sm:$0x1]  }
   0x4   :  { %v108_v7 = vld [vmem:[%s207_s0 + $0x8] sm:$0x1]   ;;  %s137_s28 = smov 72   ;;  %s138_s29 = smov 64   ;;  %v109_v8 = vld [vmem:[%s207_s0 + $0x7] sm:$0x1]  }
   0x5   :  { %s139_s3 = smov 56   ;;  %v110_v9 = vld [vmem:[%s207_s0 + $0x6] sm:$0x1]   ;;  %v111_v10 = vld [vmem:[%s207_s0 + $0x5] sm:$0x1]   ;;  %s140_s8 = smov 48  }
   0x6   :  { %s141_s9 = smov 40   ;;  %v112_v11 = vld [vmem:[%s207_s0 + $0x4] sm:$0x1]   ;;  %s142_s12 = smov 32   ;;  %v113_v12 = vld [vmem:[%s207_s0 + $0x3] sm:$0x1]  }
   0x7   :  { %v114_v13 = vld [vmem:[%s207_s0 + $0x2] sm:$0x1]   ;;  %s143_s17 = smov 24   ;;  %s144_s18 = smov 16   ;;  %v115_v14 = vld [vmem:[%s207_s0 + $0x1] sm:$0x1]  }
   0x8   :  { %s145_s21 = smov 8   ;;  %v2_v15 = vld [vmem:[%s207_s0] sm:$0x1]   ;;  %vm27_vm4 = vcmask 851712   ;;  %vm33_vm5 = vcmask 786112   ;;  %vm39_vm6 = vcmask 720512  }
   0x9   :  { %4 = vst.msk [vmem:[#allocation0] sm:$0x1] %vm3_vm0, %v2_v15   ;;  %vm45_vm7 = vcmask 654912   ;;  %vm51_vm8 = vcmask 589312   ;;  %vm57_vm9 = vcmask 523712   ;;  %vm63_vm10 = vcmask 458112  }
   0xa   :  { %13 = vrot.lane.b32.xlu0 %v102_v3, %s134_s19  ;;  %25 = vrot.lane.b32.xlu1 %v104_v4, %s135_s20  ;;  %vm69_vm11 = vcmask 392512   ;;  %vm75_vm12 = vcmask 326912   ;;  %vm81_vm13 = vcmask 261312   ;;  %vm87_vm14 = vcmask 195712  }
   0xb   :  { %37 = vrot.lane.b32.xlu2 %v106_v5, %s136_s23  ;;  %vm93_vm15 = vcmask 130112  }
  0x12   :  { %43 = vrot.lane.b32.xlu0 %v107_v6, %s137_s28  ;;  %49 = vrot.lane.b32.xlu1 %v108_v7, %s138_s29 }
  0x13   :  { %55 = vrot.lane.b32.xlu2 %v109_v8, %s139_s3 }
  0x1a   :  { %61 = vrot.lane.b32.xlu0 %v110_v9, %s140_s8  ;;  %67 = vrot.lane.b32.xlu1 %v111_v10, %s141_s9 }
  0x1b   :  { %73 = vrot.lane.b32.xlu2 %v112_v11, %s142_s12 }
  0x22   :  { %79 = vrot.lane.b32.xlu0 %v113_v12, %s143_s17  ;;  %85 = vrot.lane.b32.xlu1 %v114_v13, %s144_s18 }
  0x23   :  { %91 = vrot.lane.b32.xlu2 %v115_v14, %s145_s21 }
  0x5d   :  { %v32_v16 = vpop.permute.xlu2 %31  }
  0x65   :  { %v38_v17 = vpop.permute.xlu2 %37  }
  0x6d   :  { %v56_v18 = vpop.permute.xlu2 %55  }
  0x74   :  { %v8_v19 = vpop.permute.xlu0 %7   ;;  %v20_v20 = vpop.permute.xlu1 %19  }
  0x75   :  { %10 = vst.msk [vmem:[#allocation0] sm:$0x1] %vm9_vm1, %v8_v19   ;;  %v74_v21 = vpop.permute.xlu2 %73  }
  0x7c   :  { %v14_v22 = vpop.permute.xlu0 %13   ;;  %v26_v23 = vpop.permute.xlu1 %25  }
  0x7d   :  { %16 = vst.msk [vmem:[#allocation0] sm:$0x1] %vm15_vm2, %v14_v22   ;;  %v92_v24 = vpop.permute.xlu2 %91  }
  0x7e   :  { %22 = vst.msk [vmem:[#allocation0] sm:$0x1] %vm21_vm3, %v20_v20  }
  0x7f   :  { %28 = vst.msk [vmem:[#allocation0] sm:$0x1] %vm27_vm4, %v26_v23  }
  0x80   :  { %34 = vst.msk [vmem:[#allocation0] sm:$0x1] %vm33_vm5, %v32_v16  }
  0x81   :  { %40 = vst.msk [vmem:[#allocation0] sm:$0x1] %vm39_vm6, %v38_v17  }
  0x84   :  { %v44_v25 = vpop.permute.xlu0 %43   ;;  %v50_v26 = vpop.permute.xlu1 %49  }
  0x85   :  { %46 = vst.msk [vmem:[#allocation0] sm:$0x1] %vm45_vm7, %v44_v25  }
  0x86   :  { %52 = vst.msk [vmem:[#allocation0] sm:$0x1] %vm51_vm8, %v50_v26  }
  0x87   :  { %58 = vst.msk [vmem:[#allocation0] sm:$0x1] %vm57_vm9, %v56_v18  }
  0x8c   :  { %v62_v27 = vpop.permute.xlu0 %61   ;;  %v68_v28 = vpop.permute.xlu1 %67  }
  0x8d   :  { %64 = vst.msk [vmem:[#allocation0] sm:$0x1] %vm63_vm10, %v62_v27  }
  0x8e   :  { %70 = vst.msk [vmem:[#allocation0] sm:$0x1] %vm69_vm11, %v68_v28  }
  0x8f   :  { %76 = vst.msk [vmem:[#allocation0] sm:$0x1] %vm75_vm12, %v74_v21  }
  0x94   :  { %v80_v29 = vpop.permute.xlu0 %79   ;;  %v86_v30 = vpop.permute.xlu1 %85  }
  0x95   :  { %82 = vst.msk [vmem:[#allocation0] sm:$0x1] %vm81_vm13, %v80_v29  }
  0x96   :  { %88 = vst.msk [vmem:[#allocation0] sm:$0x1] %vm87_vm14, %v86_v30  }
  0x97   :  { %94 = vst.msk [vmem:[#allocation0] sm:$0x1] %vm93_vm15, %v92_v24  }
  0x9e   :  { %v97_v31 = vld [vmem:[#allocation0] sm:$0x1] }
  0x9f   :  { %100 = vst [vmem:[%s208_s1] sm:$0x1] %v97_v31 }

// kernel: double_conv.1
= control target key start
LH: loop header
LB: loop body
LE: loop exit
PB: predicated region body
PF: predicated region fallthrough
CT: control target
= control target key end

     0   :  { %s1277_s24 = smov 0   ;;  %s1474_s0 = inlined_call_operand.vmem [shape: bf16[2,16,64], index: 0, kind: input, shape index: {}]   ;;  %s1475_s1 = inlined_call_operand.vmem [shape: bf16[216,128], index: 1, kind: input, shape index: {}]   ;;  %s1476_s2 = inlined_call_operand.vmem [shape: f32[1,128], index: 2, kind: input, shape index: {}]   ;;  %s1477_s3 = inlined_call_operand.vmem [shape: f32[1,128], index: 3, kind: input, shape index: {}]   ;;  %s1478_s4 = inlined_call_operand.vmem [shape: bf16[432,128], index: 4, kind: input, shape index: {}]   ;;  %s1479_s5 = inlined_call_operand.vmem [shape: f32[1,128], index: 5, kind: input, shape index: {}]   ;;  %s1480_s6 = inlined_call_operand.vmem [shape: f32[1,128], index: 6, kind: input, shape index: {}]   ;;  %s1481_s7 = inlined_call_operand.vmem [shape: f32[2,16,128], index: 7, kind: output, shape index: {}]  }
   0x1 LB: > { %s942_s25 = sadd.s32 4294967295, %s1229_s24   ;;  %p946_p0 = scmp.ge.s32.totalorder %s1229_s24, 1  ;;  %s1229_s24 = sphi %s1277_s24, %s17_s24  }
   0x2   : > { %p237_p1 = scmp.lt.s32.totalorder %s1229_s24, 3 }
   0x4   : > { %p238_p2 = pnand %p946_p0, %p237_p1 }
   0x5   : > { %p269_p3 = scmp.lt.s32.totalorder (!%p238_p2), %s942_s25, 1  ;;  %s1231_s30 = smov (!%p238_p2), 4  }
   0x6   : > { %241 = sbr.rel (%p238_p2) target bundleno = 804 (0x324), region = 48  ;;  %s1232_s11 = smov (!%p238_p2), 16  }
   0x7   : > { %s1233_s12 = smov (!%p238_p2), 72   ;;  %s1234_s13 = smov (!%p238_p2), 8  }
   0xb   : > { %s1483_s25 = smov (!%p269_p3, %s942_s25), 1  ;;  %v1128_v4 = vld [vmem:[%s1475_s1 + $0x38] sm:$0xff]  ;;  %v369_v5 = vld [vmem:[%s1475_s1 + $0x68] sm:$0xf]  ;;  %v1127_v6 = vld [vmem:[%s1475_s1 + $0x30] sm:$0xff]  ;;  %vm455_vm0 = vcmask 1043456  }
   0xc   : > { %s1119_s26 = sshll.u32 %s1483_s25, 3  ;;  %459 = vmatpush.bf16.msra.mxu0 %v1128_v4  ;;  %v423_v7 = vunpack.c.l.b16 %v369_v5  ;;  %v1126_v9 = vld [vmem:[%s1475_s1 + $0x28] sm:$0xff]  ;;  %v1133_v11 = vld [vmem:[%s1475_s1 + $0x60] sm:$0xff]  ;;  %v1132_v13 = vld [vmem:[%s1475_s1 + $0x58] sm:$0xff]  ;;  %vm292_vm1 = vcmask 31744   ;;  %vm295_vm2 = vcmask 556032  }
   0xd   : > { %s273_s29 = scalar_lea.vmem %s1474_s0, %s1119_s26  ;;  %v1125_v12 = vld [vmem:[%s1475_s1 + $0x20] sm:$0xff]  ;;  %v1124_v14 = vld [vmem:[%s1475_s1 + $0x18] sm:$0xff]  ;;  %v1131_v15 = vld [vmem:[%s1475_s1 + $0x50] sm:$0xff]  ;;  %vm300_vm3 = vcmask 1040384   ;;  %vm323_vm4 = vcmask 1045504   ;;  %vm311_vm5 = vcmask 1046528  }
   0xe   : > { %v1162_v0 = vld [vmem:[%s273_s29] sm:$0xff]   ;;  %v437_v8 = vpack.c.b16 %v423_v7, %v423_v7  ;;  %v1123_v17 = vld [vmem:[%s1475_s1 + $0x10] sm:$0xff]  ;;  %v1130_v20 = vld [vmem:[%s1475_s1 + $0x48] sm:$0xff]  ;;  %vm335_vm6 = vcmask 588800   ;;  %vm338_vm7 = vcmask 130048   ;;  %vm451_vm8 = vcmask 719872  }
   0xf   : > { %v1163_v1 = vunpack.c.l.bf16 %v1162_v0  ;;  %v1164_v2 = vunpack.c.h.bf16 %v1162_v0  ;;  %v1122_v25 = vld [vmem:[%s1475_s1 + $0x8] sm:$0xff]  ;;  %v1121_v43 = vld [vmem:[%s1475_s1] sm:$0xff]  ;;  %v1141_v57 = vld [vmem:[%s1478_s4 + $0x38] sm:$0xff]  ;;  %vm509_vm9 = vcmask 64512   ;;  %vm1235_vm11 = vmmov 1   ;;  %s1120_s20 = sshll.u32 %s1483_s25, 4 }
  0x10   : > { %460 = vmatpush.bf16.msra.mxu0 %v1127_v6  ;;  %v457_v10 = vsel %vm455_vm0, %v437_v8, 0  ;;  %v1129_v44 = vld [vmem:[%s1475_s1 + $0x40] sm:$0xff]  ;;  %815 = vmatpush.bf16.msra.mxu2 %v1141_v57  ;;  %v1140_v58 = vld [vmem:[%s1478_s4 + $0x30] sm:$0xff]  ;;  %v1139_v59 = vld [vmem:[%s1478_s4 + $0x28] sm:$0xff]  ;;  %vm580_vm13 = vcmask 261120   ;;  %vm811_vm14 = vcmask 392192  }
  0x11   : > { %v1179_v3 = vpack.i.bf16 %v1164_v2, %v1163_v1  ;;  %475 = vmatpush.bf16.msra.mxu1 %v457_v10  ;;  %v1138_v60 = vld [vmem:[%s1478_s4 + $0x20] sm:$0xff]  ;;  %v1137_v63 = vld [vmem:[%s1478_s4 + $0x18] sm:$0xff]  ;;  %v1136_v2 = vld [vmem:[%s1478_s4 + $0x10] sm:$0xff] }
  0x12   : > { %v1219_v1 = vld [vmem:[%s1476_s2] ss:$0 sm:$0xff]  ;;  %vm1112_vm10 = vmneg %vm300_vm3 }
  0x13   : > { %1180 = vrot.lane.b32.xlu0 %v1179_v3, %s1231_s30  ;;  %v1220_v4 = vld [vmem:[%s1477_s3] ss:$0 sm:$0xff]  ;;  %vm1113_vm12 = vmpackc.low %vm1235_vm11, %vm1112_vm10 }
  0x14   : > { %461 = vmatpush.bf16.msra.mxu0 %v1126_v9  ;;  %816 = vmatpush.bf16.msra.mxu2 %v1140_v58 }
  0x15   : > { %476 = vmatpush.bf16.msra.mxu1 %v1133_v11 }
  0x18   : > { %462 = vmatpush.bf16.msra.mxu0 %v1125_v12  ;;  %817 = vmatpush.bf16.msra.mxu2 %v1139_v59  ;;  %v1143_v59 = vld [vmem:[%s1478_s4 + $0x48] sm:$0xff] }
  0x19   : > { %477 = vmatpush.bf16.msra.mxu1 %v1132_v13 }
  0x1c   : > { %463 = vmatpush.bf16.msra.mxu0 %v1124_v14  ;;  %818 = vmatpush.bf16.msra.mxu2 %v1138_v60  ;;  %v1135_v14 = vld [vmem:[%s1478_s4 + $0x8] sm:$0xff] }
  0x1d   : > { %478 = vmatpush.bf16.msra.mxu1 %v1131_v15  ;;  %v1134_v15 = vld [vmem:[%s1478_s4] sm:$0xff] }
  0x20   : > { %464 = vmatpush.bf16.msra.mxu0 %v1123_v17  ;;  %819 = vmatpush.bf16.msra.mxu2 %v1137_v63  ;;  %v1148_v17 = vld [vmem:[%s1478_s4 + $0x70] sm:$0xff] }
  0x21   : > { %479 = vmatpush.bf16.msra.mxu1 %v1130_v20 }
  0x24   : > { %465 = vmatpush.bf16.msra.mxu0 %v1122_v25  ;;  %820 = vmatpush.bf16.msra.mxu2 %v1136_v2  ;;  %v1142_v2 = vld [vmem:[%s1478_s4 + $0x40] sm:$0xff] }
  0x25   : > { %480 = vmatpush.bf16.msra.mxu1 %v1129_v44 }
  0x28   : > { %466 = vmatpush.bf16.msra.mxu0 %v1121_v43  ;;  %821 = vmatpush.bf16.msra.mxu2 %v1135_v14 }
  0x2c   : > { %822 = vmatpush.bf16.msra.mxu2 %v1134_v15 }
  0x85   : > { %v1181_v16 = vpop.permute.xlu0 %1180 }
  0x86   : > { %v1183_v18 = vunpack.i.h.bf16 %v1181_v16  ;;  %v1182_v19 = vunpack.i.l.bf16 %v1181_v16  ;;  %v1149_v16 = vld [vmem:[%s1478_s4 + $0x78] sm:$0xff] }
  0x87   : > { %829 = vmatpush.bf16.msra.mxu3 %v1149_v16 }
  0x88   : > { %v294_v21 = vsel %vm292_vm1, 0.0, %v1183_v18  ;;  %v293_v22 = vsel %vm292_vm1, 0.0, %v1182_v19  ;;  %v1157_v18 = vld [vmem:[%s1478_s4 + $0xb8] sm:$0xff]  ;;  %v1147_v19 = vld [vmem:[%s1478_s4 + $0x68] sm:$0xff] }
  0x89   : > { %v297_v23 = vsel %vm295_vm2, %v294_v21, 0.0  ;;  %v296_v24 = vsel %vm295_vm2, %v293_v22, 0.0  ;;  %843 = vmatpush.bf16.msrb.mxu1 %v1157_v18 }
  0x8a   : > { %v302_v26 = vrot.slane %v297_v23, 7  ;;  %v301_v27 = vrot.slane %v296_v24, 7  ;;  %v1146_v23 = vld [vmem:[%s1478_s4 + $0x60] sm:$0xff] }
  0x8b   : > { %830 = vmatpush.bf16.msra.mxu3 %v1148_v17 }
  0x8c   : > { %v308_v28 = vsel %vm300_vm3, %v302_v26, 0.0  ;;  %v307_v29 = vsel %vm300_vm3, 0.0, %v301_v27  ;;  %v303_v30 = vsel %vm300_vm3, %v301_v27, %v302_v26 }
  0x8d   : > { %v315_v31 = vrot.slane %v308_v28, 1  ;;  %v312_v32 = vrot.slane %v307_v29, 1  ;;  %v324_v33 = vrot.slane %v307_v29, 2  ;;  %v325_v34 = vrot.slane %v303_v30, 2 }
  0x8e   : > { %v327_v35 = vrot.slane %v308_v28, 2  ;;  %v313_v36 = vrot.slane %v303_v30, 1 }
  0x8f   : > { %v326_v37 = vsel %vm323_vm4, %v324_v33, %v325_v34  ;;  %831 = vmatpush.bf16.msra.mxu3 %v1147_v19 }
  0x90   : > { %v328_v38 = vsel %vm323_vm4, %v325_v34, %v327_v35  ;;  %v314_v39 = vsel %vm311_vm5, %v312_v32, %v313_v36  ;;  %v316_v40 = vsel %vm311_vm5, %v313_v36, %v315_v31  ;;  %v1145_v32 = vld [vmem:[%s1478_s4 + $0x58] sm:$0xff] }
  0x91   : > { %v1189_v41 = vpack.i.bf16 %v328_v38, %v326_v37  ;;  %v1184_v42 = vpack.i.bf16 %v316_v40, %v314_v39 }
  0x93   : > { %1190 = vrot.lane.b32.xlu1 %v1189_v41, %s1232_s11  ;;  %1185 = vrot.lane.b32.xlu0 %v1184_v42, %s1233_s12  ;;  %s1236_s12 = smov 32  }
  0x94   : > { %832 = vmatpush.bf16.msra.mxu3 %v1146_v23 }
  0x98   : > { %833 = vmatpush.bf16.msra.mxu3 %v1145_v32 }
 0x105   : > { %v1191_v45 = vpop.permute.xlu1 %1190  ;;  %v1186_v46 = vpop.permute.xlu0 %1185 }
 0x106   : > { %v1193_v47 = vunpack.i.h.bf16 %v1191_v45  ;;  %v1192_v48 = vunpack.i.l.bf16 %v1191_v45  ;;  %v1188_v49 = vunpack.i.h.bf16 %v1186_v46  ;;  %v1187_v50 = vunpack.i.l.bf16 %v1186_v46 }
 0x108   : > { %v336_v51 = vsel %vm335_vm6, %v307_v29, %v1187_v50  ;;  %v337_v52 = vsel %vm335_vm6, %v303_v30, %v1188_v49  ;;  %v339_v53 = vsel %vm338_vm7, %v1187_v50, %v1192_v48  ;;  %v340_v54 = vsel %vm338_vm7, %v1188_v49, %v1193_v47  ;;  %v1144_v47 = vld [vmem:[%s1478_s4 + $0x50] sm:$0xff] }
 0x109   : > { %v341_v55 = vpack.c.bf16 %v337_v52, %v336_v51  ;;  %v342_v56 = vpack.c.bf16 %v340_v54, %v339_v53  ;;  %834 = vmatpush.bf16.msra.mxu3 %v1144_v47 }
 0x10b   : > { %467 = vmatmul.bf16.vlgmr.msra.gmra.mxu0 %v341_v55  ;;  %1003 = vmatmul.msk.bf16.vlgmr.msra.gmra.mxu1 %vm451_vm8, %v342_v56 }
 0x10d   : > { %835 = vmatpush.bf16.msra.mxu3 %v1143_v59 }
 0x111   : > { %836 = vmatpush.bf16.msra.mxu3 %v1142_v2 }
 0x188   : > { %v468_v61 = vpop.f32.mrf.mxu0  ;;  %v482_v62 = vpop.f32.mrf.mxu1 }
 0x189   : > { %v483_v0 = vadd.f32 %v482_v62, %v468_v61 }
 0x18b   : > { %v491_v3 = vmul.f32 %v1219_v1, %v483_v0 }
 0x18d   : > { %v497_v8 = vadd.f32 %v1220_v4, %v491_v3  ;;  %v1156_v3 = vld [vmem:[%s1478_s4 + $0xb0] sm:$0xff] }
 0x18e   : > { %844 = vmatpush.bf16.msrb.mxu1 %v1156_v3 }
 0x18f   : > { %v499_v11 = vmax.f32 %v497_v8, 0.0  ;;  %v1159_v8 = vld [vmem:[%s1478_s4 + $0xc8] sm:$0xff] }
 0x190   : > { %v470_v5 = vpop.f32.mrf.mxu0  ;;  %v484_v6 = vpop.f32.mrf.mxu1 }
 0x191   : > { %v485_v7 = vadd.f32 %v484_v6, %v470_v5  ;;  %v1154_v5 = vld [vmem:[%s1478_s4 + $0xa0] sm:$0xff]  ;;  %v1160_v6 = vld [vmem:[%s1478_s4 + $0xd0] sm:$0xff] }
 0x192   : > { %862 = vmatpush.bf16.msrb.mxu0 %v1160_v6 }
 0x193   : > { %v492_v9 = vmul.f32 %v1219_v1, %v485_v7  ;;  %v1153_v7 = vld [vmem:[%s1478_s4 + $0x98] sm:$0xff] }
 0x195   : > { %v498_v10 = vadd.f32 %v1220_v4, %v492_v9  ;;  %v1155_v4 = vld [vmem:[%s1478_s4 + $0xa8] sm:$0xff]  ;;  %v1152_v9 = vld [vmem:[%s1478_s4 + $0x90] sm:$0xff] }
 0x196   : > { %845 = vmatpush.bf16.msrb.mxu1 %v1155_v4  ;;  %863 = vmatpush.bf16.msrb.mxu0 %v1159_v8 }
 0x197   : > { %v500_v12 = vmax.f32 %v498_v10, 0.0  ;;  %v1151_v10 = vld [vmem:[%s1478_s4 + $0x88] sm:$0xff] }
 0x199   : > { %v1194_v13 = vpack.i.bf16 %v500_v12, %v499_v11  ;;  %v1150_v11 = vld [vmem:[%s1478_s4 + $0x80] sm:$0xff] }
 0x19a   : > { %846 = vmatpush.bf16.msrb.mxu1 %v1154_v5  ;;  %v1158_v12 = vld [vmem:[%s1478_s4 + $0xc0] sm:$0xff] }
 0x19b   : > { %1195 = vrot.lane.b32.xlu1 %v1194_v13, %s1234_s13  ;;  %864 = vmatpush.bf16.msrb.mxu0 %v1158_v12 }
 0x19e   : > { %847 = vmatpush.bf16.msrb.mxu1 %v1153_v7 }
 0x1a2   : > { %848 = vmatpush.bf16.msrb.mxu1 %v1152_v9 }
 0x1a6   : > { %849 = vmatpush.bf16.msrb.mxu1 %v1151_v10 }
 0x1aa   : > { %850 = vmatpush.bf16.msrb.mxu1 %v1150_v11 }
 0x20d   : > { %v1196_v20 = vpop.permute.xlu1 %1195 }
 0x20e   : > { %v1198_v21 = vunpack.i.h.bf16 %v1196_v20  ;;  %v1197_v22 = vunpack.i.l.bf16 %v1196_v20 }
 0x210   : > { %v511_v24 = vsel %vm509_vm9, 0.0, %v1198_v21  ;;  %v513_v25 = vsel %vm509_vm9, %v1198_v21, 0.0  ;;  %v510_v26 = vsel %vm509_vm9, 0.0, %v1197_v22  ;;  %v512_v27 = vsel %vm509_vm9, %v1197_v22, 0.0 }
 0x211   : > { %v520_v28 = vrot.slane %v511_v24, 7  ;;  %v522_v29 = vrot.slane %v513_v25, 7  ;;  %v518_v30 = vrot.slane %v510_v26, 7  ;;  %v519_v31 = vrot.slane %v512_v27, 7 }
 0x213   : > { %v532_v33 = vsel %vm300_vm3, %v520_v28, 0.0  ;;  %v533_v34 = vsel %vm300_vm3, %v522_v29, 0.0  ;;  %v1395_v35 = vsel %vm300_vm3, %v519_v31, %v522_v29  ;;  %v530_v36 = vsel %vm300_vm3, 0.0, %v518_v30 }
 0x214   : > { %v568_v37 = vrot.slane %v532_v33, 2  ;;  %v570_v38 = vrot.slane %v533_v34, 2  ;;  %v1399_v39 = vsel %vm300_vm3, 0.0, %v519_v31  ;;  %v521_v41 = vsel %vm300_vm3, %v518_v30, %v520_v28 }
 0x215   : > { %v565_v40 = vrot.slane %v1399_v39, 2  ;;  %v566_v42 = vrot.slane %v1395_v35, 2  ;;  %v563_v43 = vrot.slane %v521_v41, 2  ;;  %v1114_v44 = vpack.c.bf16 %v521_v41, %v518_v30 }
 0x216   : > { %v562_v45 = vrot.slane %v530_v36, 2  ;;  %v538_v46 = vrot.slane %v530_v36, 1  ;;  %v539_v50 = vrot.slane %v521_v41, 1  ;;  %v544_v51 = vrot.slane %v532_v33, 1 }
 0x217   : > { %v567_v48 = vsel %vm323_vm4, %v565_v40, %v566_v42  ;;  %v571_v49 = vsel %vm323_vm4, %v566_v42, %v570_v38  ;;  %1115 = vmatmul.msk.bf16.vlgmr.msra.gmra.mxu2 %vm1113_vm12, %v1114_v44  ;;  %v569_v54 = vsel %vm323_vm4, %v563_v43, %v568_v37  ;;  %v546_v60 = vrot.slane %v533_v34, 1  ;;  %v1221_v42 = vld [vmem:[%s1479_s5] ss:$0 sm:$0xff] }
 0x218   : > { %v1214_v52 = vpack.i.bf16 %v571_v49, %v567_v48  ;;  %v564_v53 = vsel %vm323_vm4, %v562_v45, %v563_v43  ;;  %v540_v56 = vsel %vm311_vm5, %v538_v46, %v539_v50  ;;  %v545_v57 = vsel %vm311_vm5, %v539_v50, %v544_v51  ;;  %v1222_v44 = vld [vmem:[%s1480_s6] ss:$0 sm:$0xff] }
 0x219   : > { %v1209_v55 = vpack.i.bf16 %v569_v54, %v564_v53  ;;  %v1199_v58 = vpack.i.bf16 %v545_v57, %v540_v56  ;;  %v541_v61 = vrot.slane %v1399_v39, 1  ;;  %v542_v62 = vrot.slane %v1395_v35, 1 }
 0x21a   : > { %1215 = vrot.lane.b32.xlu1 %v1214_v52, %s1236_s12 }
 0x21b   : > { %1210 = vrot.lane.b32.xlu0 %v1209_v55, %s1236_s12  ;;  %1200 = vrot.lane.b32.xlu2 %v1199_v58, %s1232_s11  ;;  %v543_v63 = vsel %vm311_vm5, %v541_v61, %v542_v62  ;;  %v547_v0 = vsel %vm311_vm5, %v542_v62, %v546_v60 }
 0x21c   : > { %v1204_v1 = vpack.i.bf16 %v547_v0, %v543_v63 }
 0x223   : > { %1205 = vrot.lane.b32.xlu2 %v1204_v1, %s1232_s11  ;;  %s278_s11 = scalar_lea.vmem %s1481_s7, %s1120_s20 }
 0x275   : > { %v1201_v13 = vpop.permute.xlu2 %1200 }
 0x276   : > { %v1203_v14 = vunpack.i.h.bf16 %v1201_v13  ;;  %v1202_v15 = vunpack.i.l.bf16 %v1201_v13 }
 0x278   : > { %v587_v16 = vsel %vm338_vm7, %v1399_v39, %v1202_v15  ;;  %v588_v17 = vsel %vm338_vm7, %v1395_v35, %v1203_v14 }
 0x279   : > { %v592_v18 = vpack.c.bf16 %v588_v17, %v587_v16 }
 0x27b   : > { %837 = vmatmul.bf16.vlgmr.msra.gmra.mxu3 %v592_v18 }
 0x27d   : > { %v1206_v19 = vpop.permute.xlu2 %1205 }
 0x27e   : > { %v1208_v20 = vunpack.i.h.bf16 %v1206_v19  ;;  %v1207_v21 = vunpack.i.l.bf16 %v1206_v19 }
 0x280   : > { %v556_v28 = vsel %vm338_vm7, %v1202_v15, %v1207_v21  ;;  %v557_v29 = vsel %vm338_vm7, %v1203_v14, %v1208_v20 }
 0x28c   : > { %v1216_v22 = vpop.permute.xlu1 %1215 }
 0x28d   : > { %v1218_v23 = vunpack.i.h.bf16 %v1216_v22  ;;  %v1217_v24 = vunpack.i.l.bf16 %v1216_v22  ;;  %v1211_v25 = vpop.permute.xlu0 %1210 }
 0x28e   : > { %v1213_v26 = vunpack.i.h.bf16 %v1211_v25  ;;  %v1212_v27 = vunpack.i.l.bf16 %v1211_v25 }
 0x290   : > { %v582_v30 = vsel %vm580_vm13, %v1213_v26, %v1218_v23  ;;  %v581_v31 = vsel %vm580_vm13, %v1212_v27, %v1217_v24  ;;  %v589_v32 = vsel %vm580_vm13, %v556_v28, %v1212_v27  ;;  %v590_v33 = vsel %vm580_vm13, %v557_v29, %v1213_v26 }
 0x291   : > { %v594_v34 = vpack.c.bf16 %v582_v30, %v581_v31  ;;  %v593_v35 = vpack.c.bf16 %v590_v33, %v589_v32 }
 0x293   : > { %851 = vmatmul.bf16.vlgmr.msrb.gmra.mxu1 %v593_v35  ;;  %1116 = vmatmul.msk.bf16.vlgmr.msrb.gmra.mxu0 %vm811_vm14, %v594_v34 }
 0x29a   : > { %v824_v37 = vpop.f32.mrf.mxu2 }
 0x2a2   : > { %v826_v47 = vpop.f32.mrf.mxu2 }
 0x2fe   : > { %v838_v36 = vpop.f32.mrf.mxu3 }
 0x2ff   : > { %v839_v38 = vadd.f32 %v838_v36, %v824_v37 }
 0x306   : > { %v840_v45 = vpop.f32.mrf.mxu3 }
 0x307   : > { %v841_v48 = vadd.f32 %v840_v45, %v826_v47 }
 0x310   : > { %v852_v39 = vpop.f32.mrf.mxu1  ;;  %v866_v40 = vpop.f32.mrf.mxu0 }
 0x311   : > { %v853_v41 = vadd.f32 %v852_v39, %v839_v38 }
 0x313   : > { %v867_v43 = vadd.f32 %v866_v40, %v853_v41 }
 0x315   : > { %v875_v46 = vmul.f32 %v1221_v42, %v867_v43 }
 0x317   : > { %v881_v49 = vadd.f32 %v1222_v44, %v875_v46 }
 0x318   : > { %v854_v50 = vpop.f32.mrf.mxu1  ;;  %v868_v53 = vpop.f32.mrf.mxu0 }
 0x319   : > { %v883_v51 = vmax.f32 %v881_v49, 0.0  ;;  %v855_v52 = vadd.f32 %v854_v50, %v841_v48 }
 0x31b   : > { %885 = vst [vmem:[%s278_s11] sm:$0xff] %v883_v51  ;;  %v869_v54 = vadd.f32 %v868_v53, %v855_v52 }
 0x31d   : > { %v876_v55 = vmul.f32 %v1221_v42, %v869_v54 }
 0x31f   : > { %v882_v56 = vadd.f32 %v1222_v44, %v876_v55 }
 0x321   : > { %v884_v57 = vmax.f32 %v882_v56, 0.0 }
 0x323   : > { %886 = vst [vmem:[%s278_s11 + $0x8] sm:$0xff] %v884_v57 }
 0x324 PF: > { %s17_s24 = sadd.s32 1, %s1229_s24  }
 0x325   : > { %p14_p4 = scmp.ge.s32.totalorder %s17_s24, 4  }
 0x327   :  { %16 = sbr.rel (!%p14_p4) target bundleno = 1 (0x1), region = 78 }

</bundles_post_ra>
